<compile_context>
chip_gen: v6e
topology: v6e:2x2x1
jax: 0.10.0
libtpu: 0.0.40
codegen_flags: <defaults>
</compile_context>

<pallas_src>
import jax
import jax.numpy as jnp
from jax import lax
from jax.experimental import pallas as pl
from jax.experimental.pallas import tpu as pltpu

NEG_SLOPE = 0.2       # GATConv default negative_slope
MASK_NEG = -1e30      # "-inf" for masked (non-edge) attention entries (folded into escore)


# ----------------------------- Pallas kernel -------------------------------

def _gat_layer(x, w, a_dst_x, a_src_x_row, esc, bias):
    """One GATConv (heads=1) on VMEM-resident values.

    x:           [N, Fi]   node features (layer input)
    w:           [Fi, Fo]  lin weight
    a_dst_x:     [Fi, 1]   pre-combined w @ att_dst  (so x @ a_dst_x == h @ att_dst)
    a_src_x_row: [1, Fi]   pre-combined (w @ att_src)^T
    esc:         [N, N]    dense edge-attention scores, MASK_NEG at non-edges
    bias:        [1, Fo]
    """
    h = jnp.dot(x, w, preferred_element_type=jnp.float32)                      # [N, Fo]

    s_dst = jnp.dot(x, a_dst_x, preferred_element_type=jnp.float32)            # [N, 1]
    # lane-major source scores: contract Fi of both operands -> [1, N] (no NxN transpose)
    s_src = lax.dot_general(a_src_x_row, x,
                            dimension_numbers=(((1,), (1,)), ((), ())),
                            preferred_element_type=jnp.float32)                # [1, N]

    logits = s_dst + s_src + esc                                               # [N, N]
    logits = jnp.where(logits < 0.0, NEG_SLOPE * logits, logits)               # LeakyReLU
    # masked (non-edge) entries carry ~MASK_NEG through LeakyReLU -> exp underflows to 0.

    m = jnp.max(logits, axis=-1, keepdims=True)                                # softmax over src
    p = jnp.exp(logits - m)
    denom = jnp.sum(p, axis=-1, keepdims=True)                                 # [N, 1]

    acc = jnp.dot(p, h, preferred_element_type=jnp.float32)                    # [N, Fo]
    # deferred normalization: N reciprocals on the EUP instead of N^2 divides on the VALU
    return acc * pl.reciprocal(denom, approx=True) + bias


def gat2_fused_kernel(x_ref, esc1_ref, esc2_ref,
                      w1_ref, adst1_ref, asrc1_ref, b1_ref,
                      w2_ref, adst2_ref, asrc2_ref, b2_ref,
                      out_ref):
    x = x_ref[...]

    h1 = _gat_layer(x, w1_ref[...], adst1_ref[...], asrc1_ref[...],
                    esc1_ref[...], b1_ref[...])
    h1 = jnp.maximum(h1, 0.0)                                                  # ReLU between layers
    # TODO(synk): dropout between layers is omitted (PyG default p=0.0 / eval mode).

    h2 = _gat_layer(h1, w2_ref[...], adst2_ref[...], asrc2_ref[...],
                    esc2_ref[...], b2_ref[...])

    # Sigmoid via EUP: exp + approx reciprocal
    out_ref[...] = pl.reciprocal(1.0 + jnp.exp(-h2), approx=True)


# ------------------------------ JAX glue ------------------------------------

def build_masked_scores(edge_index, edge_attr, n_nodes, params):
    """Dense per-layer edge-attention scores with the adjacency mask folded in.

    Non-edges get MASK_NEG; self-loops (PyG add_self_loops=True) get the score of
    the mean edge_attr (PyG fill_value='mean').  The sparse->dense scatter pattern
    is built once and reused for both layers.
    """
    src, dst = edge_index[0], edge_index[1]
    diag = jnp.arange(n_nodes)
    mean_attr = jnp.mean(edge_attr, axis=0, keepdims=True)
    base = jnp.full((n_nodes, n_nodes), MASK_NEG, jnp.float32)

    def one(w_edge, att_edge):
        e = (edge_attr @ w_edge) @ att_edge                      # [E, 1]
        s = ((mean_attr @ w_edge) @ att_edge)[0, 0]              # self-loop score
        return base.at[dst, src].set(e[:, 0]).at[diag, diag].set(s)

    esc1 = one(params["w_edge1"], params["att_edge1"])
    esc2 = one(params["w_edge2"], params["att_edge2"])
    return esc1, esc2


def gat_model_forward(x, edge_index, edge_attr, params):
    """GATModel.forward: 2-layer GAT (heads=1, ReLU between) -> sigmoid -> squeeze."""
    n = x.shape[0]
    esc1, esc2 = build_masked_scores(edge_index, edge_attr, n, params)

    # Pre-combine attention vectors with the layer weights (tiny param-side matmuls):
    #   h @ a == x @ (w @ a), so the kernel only needs x.
    adst1 = params["w1"] @ params["a_dst1"]            # [F_IN, 1]
    asrc1 = (params["w1"] @ params["a_src1"]).T        # [1, F_IN]
    adst2 = params["w2"] @ params["a_dst2"]            # [HID, 1]
    asrc2 = (params["w2"] @ params["a_src2"]).T        # [1, HID]

    vmem = pl.BlockSpec(memory_space=pltpu.MemorySpace.VMEM)     # whole array resident in VMEM
    out = pl.pallas_call(
        gat2_fused_kernel,
        out_shape=jax.ShapeDtypeStruct((n, 1), jnp.float32),
        in_specs=[vmem] * 11,
        out_specs=vmem,
        compiler_params=pltpu.CompilerParams(vmem_limit_bytes=32 * 1024 * 1024),
    )(x, esc1, esc2,
      params["w1"], adst1, asrc1, params["b1"],
      params["w2"], adst2, asrc2, params["b2"])

    return jnp.squeeze(out)                                      # [N, 1] -> [N]


# Pure-jnp reference with the original PyG-style ordering (separate mask, exact softmax
# and sigmoid) to validate the fused kernel (mask-folding, pre-combined attention
# vectors, deferred normalization, approx reciprocals).
def _ref_forward(x, edge_index, edge_attr, params):
    n = x.shape[0]
    src, dst = edge_index[0], edge_index[1]
    diag = jnp.arange(n)
    mask = jnp.zeros((n, n), jnp.float32).at[dst, src].set(1.0).at[diag, diag].set(1.0)
    mean_attr = jnp.mean(edge_attr, axis=0, keepdims=True)

    def escore(w_e, att_e):
        e = (edge_attr @ w_e) @ att_e
        s = ((mean_attr @ w_e) @ att_e)[0, 0]
        return jnp.zeros((n, n), jnp.float32).at[dst, src].set(e[:, 0]).at[diag, diag].set(s)

    def layer(xx, w, a_src, a_dst, esc, bias, relu, sig):
        h = xx @ w
        logits = (h @ a_dst) + (h @ a_src).T + esc
        logits = jnp.where(logits < 0, NEG_SLOPE * logits, logits)
        logits = jnp.where(mask > 0, logits, MASK_NEG)
        alpha = jax.nn.softmax(logits, axis=-1)
        out = alpha @ h + bias
        if relu:
            out = jnp.maximum(out, 0.0)
        if sig:
            out = jax.nn.sigmoid(out)
        return out

    e1 = escore(params["w_edge1"], params["att_edge1"])
    e2 = escore(params["w_edge2"], params["att_edge2"])
    h1 = layer(x, params["w1"], params["a_src1"], params["a_dst1"], e1, params["b1"], True, False)
    o = layer(h1, params["w2"], params["a_src2"], params["a_dst2"], e2, params["b2"], False, True)
    return jnp.squeeze(o)


# ------------------------------- main ---------------------------------------

if __name__ == "__main__":
    # Small synthetic config (GAT(in=8, hidden=32, out=1, num_layers=2, heads=1, edge_dim=4))
    N, F_IN, HID, F_OUT, E_DIM = 16, 8, 32, 1, 4

    key = jax.random.PRNGKey(0)
    keys = jax.random.split(key, 12)

    # Node features.
    x = jax.random.normal(keys[0], (N, F_IN), jnp.float32)

    # Deterministic ring-style graph: edges i -> (i+1)%N and i -> (i+5)%N (no duplicates).
    srcs = jnp.arange(N, dtype=jnp.int32)
    edge_index = jnp.stack([jnp.concatenate([srcs, srcs]),
                            jnp.concatenate([(srcs + 1) % N, (srcs + 5) % N])])   # [2, 32]
    edge_attr = jax.random.normal(keys[1], (2 * N, E_DIM), jnp.float32)           # [32, 4]

    s = 0.3  # deterministic glorot-ish scale
    params = {
        # layer 1: GATConv(F_IN -> HID, heads=1, edge_dim=E_DIM)
        "w1":        s * jax.random.normal(keys[2], (F_IN, HID), jnp.float32),
        "a_src1":    s * jax.random.normal(keys[3], (HID, 1), jnp.float32),
        "a_dst1":    s * jax.random.normal(keys[4], (HID, 1), jnp.float32),
        "w_edge1":   s * jax.random.normal(keys[5], (E_DIM, HID), jnp.float32),
        "att_edge1": s * jax.random.normal(keys[6], (HID, 1), jnp.float32),
        "b1":        jnp.zeros((1, HID), jnp.float32),
        # layer 2: GATConv(HID -> F_OUT, heads=1, edge_dim=E_DIM)
        "w2":        s * jax.random.normal(keys[7], (HID, F_OUT), jnp.float32),
        "a_src2":    s * jax.random.normal(keys[8], (F_OUT, 1), jnp.float32),
        "a_dst2":    s * jax.random.normal(keys[9], (F_OUT, 1), jnp.float32),
        "w_edge2":   s * jax.random.normal(keys[10], (E_DIM, F_OUT), jnp.float32),
        "att_edge2": s * jax.random.normal(keys[11], (F_OUT, 1), jnp.float32),
        "b2":        jnp.zeros((1, F_OUT), jnp.float32),
    }

    out = jax.block_until_ready(gat_model_forward(x, edge_index, edge_attr, params))
    ref = jax.block_until_ready(_ref_forward(x, edge_index, edge_attr, params))

    assert out.shape == (N,), out.shape
    # approx EUP reciprocals (softmax scale + sigmoid) -> slightly relaxed tolerance
    assert jnp.allclose(out, ref, atol=2e-3, rtol=2e-3), (out, ref)
    print("KERNEL_OK")
</pallas_src>

<mosaic_0001>
module attributes {stable_mosaic.version = 11 : i64} {
  func.func @gat2_fused_kernel(%arg0: memref<16x8xf32, #tpu.memory_space<vmem>>, %arg1: memref<16x16xf32, #tpu.memory_space<vmem>>, %arg2: memref<16x16xf32, #tpu.memory_space<vmem>>, %arg3: memref<8x32xf32, #tpu.memory_space<vmem>>, %arg4: memref<8x1xf32, #tpu.memory_space<vmem>>, %arg5: memref<1x8xf32, #tpu.memory_space<vmem>>, %arg6: memref<1x32xf32, #tpu.memory_space<vmem>>, %arg7: memref<32x1xf32, #tpu.memory_space<vmem>>, %arg8: memref<32x1xf32, #tpu.memory_space<vmem>>, %arg9: memref<1x32xf32, #tpu.memory_space<vmem>>, %arg10: memref<1x1xf32, #tpu.memory_space<vmem>>, %arg11: memref<16x1xf32, #tpu.memory_space<vmem>>) attributes {dimension_semantics = [], scalar_prefetch = 0 : i64, scratch_operands = 0 : i64, tpu.core_type = #tpu.core_type<tc>} {
    %c0 = arith.constant 0 : index
    %c0_0 = arith.constant 0 : index
    %0 = vector.load %arg0[%c0, %c0_0] : memref<16x8xf32, #tpu.memory_space<vmem>>, vector<16x8xf32>
    %c0_1 = arith.constant 0 : index
    %c0_2 = arith.constant 0 : index
    %1 = vector.load %arg3[%c0_1, %c0_2] : memref<8x32xf32, #tpu.memory_space<vmem>>, vector<8x32xf32>
    %c0_3 = arith.constant 0 : index
    %c0_4 = arith.constant 0 : index
    %2 = vector.load %arg4[%c0_3, %c0_4] : memref<8x1xf32, #tpu.memory_space<vmem>>, vector<8x1xf32>
    %c0_5 = arith.constant 0 : index
    %c0_6 = arith.constant 0 : index
    %3 = vector.load %arg5[%c0_5, %c0_6] : memref<1x8xf32, #tpu.memory_space<vmem>>, vector<1x8xf32>
    %c0_7 = arith.constant 0 : index
    %c0_8 = arith.constant 0 : index
    %4 = vector.load %arg1[%c0_7, %c0_8] : memref<16x16xf32, #tpu.memory_space<vmem>>, vector<16x16xf32>
    %c0_9 = arith.constant 0 : index
    %c0_10 = arith.constant 0 : index
    %5 = vector.load %arg6[%c0_9, %c0_10] : memref<1x32xf32, #tpu.memory_space<vmem>>, vector<1x32xf32>
    %cst = arith.constant dense<0.000000e+00> : vector<16x32xf32>
    %6 = tpu.matmul %0, %1, %cst {dimension_numbers = #tpu.dot_dimension_numbers<[1], [0], [0], [1], [0, 0, 1, 1], [], []>} : vector<16x8xf32>, vector<8x32xf32>, vector<16x32xf32> -> vector<16x32xf32>
    %cst_11 = arith.constant dense<0.000000e+00> : vector<16x1xf32>
    %7 = tpu.matmul %0, %2, %cst_11 {dimension_numbers = #tpu.dot_dimension_numbers<[1], [0], [0], [1], [0, 0, 1, 1], [], []>} : vector<16x8xf32>, vector<8x1xf32>, vector<16x1xf32> -> vector<16x1xf32>
    %cst_12 = arith.constant dense<0.000000e+00> : vector<1x16xf32>
    %8 = tpu.matmul %3, %0, %cst_12 {dimension_numbers = #tpu.dot_dimension_numbers<[1], [1], [0], [0], [0, 0, 1, 0], [], []>} : vector<1x8xf32>, vector<16x8xf32>, vector<1x16xf32> -> vector<1x16xf32>
    %9 = vector.broadcast %7 : vector<16x1xf32> to vector<16x16xf32>
    %10 = vector.broadcast %8 : vector<1x16xf32> to vector<16x16xf32>
    %11 = arith.addf %9, %10 : vector<16x16xf32>
    %12 = arith.addf %11, %4 : vector<16x16xf32>
    %cst_13 = arith.constant 0.000000e+00 : f32
    %13 = vector.broadcast %cst_13 : f32 to vector<16x16xf32>
    %14 = arith.cmpf olt, %12, %13 : vector<16x16xf32>
    %cst_14 = arith.constant 2.000000e-01 : f32
    %15 = vector.broadcast %cst_14 : f32 to vector<16x16xf32>
    %16 = arith.mulf %15, %12 : vector<16x16xf32>
    %17 = arith.select %14, %16, %12 : vector<16x16xi1>, vector<16x16xf32>
    %cst_15 = arith.constant dense<0xFF800000> : vector<16xf32>
    %18 = vector.multi_reduction <maximumf>, %17, %cst_15 [1] : vector<16x16xf32> to vector<16xf32>
    %19 = vector.shape_cast %18 : vector<16xf32> to vector<16x1xf32>
    %20 = vector.broadcast %19 : vector<16x1xf32> to vector<16x16xf32>
    %21 = arith.subf %17, %20 : vector<16x16xf32>
    %22 = math.exp %21 : vector<16x16xf32>
    %cst_16 = arith.constant dense<0.000000e+00> : vector<16xf32>
    %23 = vector.multi_reduction <add>, %22, %cst_16 [1] : vector<16x16xf32> to vector<16xf32>
    %24 = vector.shape_cast %23 : vector<16xf32> to vector<16x1xf32>
    %cst_17 = arith.constant dense<0.000000e+00> : vector<16x32xf32>
    %25 = tpu.matmul %22, %6, %cst_17 {dimension_numbers = #tpu.dot_dimension_numbers<[1], [0], [0], [1], [0, 0, 1, 1], [], []>} : vector<16x16xf32>, vector<16x32xf32>, vector<16x32xf32> -> vector<16x32xf32>
    %26 = tpu.reciprocal %24 {approx = true} : vector<16x1xf32> -> vector<16x1xf32>
    %27 = vector.broadcast %26 : vector<16x1xf32> to vector<16x32xf32>
    %28 = arith.mulf %25, %27 : vector<16x32xf32>
    %29 = vector.broadcast %5 : vector<1x32xf32> to vector<16x32xf32>
    %30 = arith.addf %28, %29 : vector<16x32xf32>
    %cst_18 = arith.constant 0.000000e+00 : f32
    %31 = vector.broadcast %cst_18 : f32 to vector<16x32xf32>
    %32 = arith.maximumf %30, %31 : vector<16x32xf32>
    %c0_19 = arith.constant 0 : index
    %c0_20 = arith.constant 0 : index
    %33 = vector.load %arg7[%c0_19, %c0_20] : memref<32x1xf32, #tpu.memory_space<vmem>>, vector<32x1xf32>
    %c0_21 = arith.constant 0 : index
    %c0_22 = arith.constant 0 : index
    %34 = vector.load %arg8[%c0_21, %c0_22] : memref<32x1xf32, #tpu.memory_space<vmem>>, vector<32x1xf32>
    %c0_23 = arith.constant 0 : index
    %c0_24 = arith.constant 0 : index
    %35 = vector.load %arg9[%c0_23, %c0_24] : memref<1x32xf32, #tpu.memory_space<vmem>>, vector<1x32xf32>
    %c0_25 = arith.constant 0 : index
    %c0_26 = arith.constant 0 : index
    %36 = vector.load %arg2[%c0_25, %c0_26] : memref<16x16xf32, #tpu.memory_space<vmem>>, vector<16x16xf32>
    %c0_27 = arith.constant 0 : index
    %c0_28 = arith.constant 0 : index
    %37 = vector.load %arg10[%c0_27, %c0_28] : memref<1x1xf32, #tpu.memory_space<vmem>>, vector<1x1xf32>
    %cst_29 = arith.constant dense<0.000000e+00> : vector<16x1xf32>
    %38 = tpu.matmul %32, %33, %cst_29 {dimension_numbers = #tpu.dot_dimension_numbers<[1], [0], [0], [1], [0, 0, 1, 1], [], []>} : vector<16x32xf32>, vector<32x1xf32>, vector<16x1xf32> -> vector<16x1xf32>
    %cst_30 = arith.constant dense<0.000000e+00> : vector<16x1xf32>
    %39 = tpu.matmul %32, %34, %cst_30 {dimension_numbers = #tpu.dot_dimension_numbers<[1], [0], [0], [1], [0, 0, 1, 1], [], []>} : vector<16x32xf32>, vector<32x1xf32>, vector<16x1xf32> -> vector<16x1xf32>
    %cst_31 = arith.constant dense<0.000000e+00> : vector<1x16xf32>
    %40 = tpu.matmul %35, %32, %cst_31 {dimension_numbers = #tpu.dot_dimension_numbers<[1], [1], [0], [0], [0, 0, 1, 0], [], []>} : vector<1x32xf32>, vector<16x32xf32>, vector<1x16xf32> -> vector<1x16xf32>
    %41 = vector.broadcast %39 : vector<16x1xf32> to vector<16x16xf32>
    %42 = vector.broadcast %40 : vector<1x16xf32> to vector<16x16xf32>
    %43 = arith.addf %41, %42 : vector<16x16xf32>
    %44 = arith.addf %43, %36 : vector<16x16xf32>
    %cst_32 = arith.constant 0.000000e+00 : f32
    %45 = vector.broadcast %cst_32 : f32 to vector<16x16xf32>
    %46 = arith.cmpf olt, %44, %45 : vector<16x16xf32>
    %cst_33 = arith.constant 2.000000e-01 : f32
    %47 = vector.broadcast %cst_33 : f32 to vector<16x16xf32>
    %48 = arith.mulf %47, %44 : vector<16x16xf32>
    %49 = arith.select %46, %48, %44 : vector<16x16xi1>, vector<16x16xf32>
    %cst_34 = arith.constant dense<0xFF800000> : vector<16xf32>
    %50 = vector.multi_reduction <maximumf>, %49, %cst_34 [1] : vector<16x16xf32> to vector<16xf32>
    %51 = vector.shape_cast %50 : vector<16xf32> to vector<16x1xf32>
    %52 = vector.broadcast %51 : vector<16x1xf32> to vector<16x16xf32>
    %53 = arith.subf %49, %52 : vector<16x16xf32>
    %54 = math.exp %53 : vector<16x16xf32>
    %cst_35 = arith.constant dense<0.000000e+00> : vector<16xf32>
    %55 = vector.multi_reduction <add>, %54, %cst_35 [1] : vector<16x16xf32> to vector<16xf32>
    %56 = vector.shape_cast %55 : vector<16xf32> to vector<16x1xf32>
    %cst_36 = arith.constant dense<0.000000e+00> : vector<16x1xf32>
    %57 = tpu.matmul %54, %38, %cst_36 {dimension_numbers = #tpu.dot_dimension_numbers<[1], [0], [0], [1], [0, 0, 1, 1], [], []>} : vector<16x16xf32>, vector<16x1xf32>, vector<16x1xf32> -> vector<16x1xf32>
    %58 = tpu.reciprocal %56 {approx = true} : vector<16x1xf32> -> vector<16x1xf32>
    %59 = arith.mulf %57, %58 : vector<16x1xf32>
    %60 = vector.broadcast %37 : vector<1x1xf32> to vector<16x1xf32>
    %61 = arith.addf %59, %60 : vector<16x1xf32>
    %cst_37 = arith.constant 0.000000e+00 : f32
    %62 = vector.broadcast %cst_37 : f32 to vector<16x1xf32>
    %63 = arith.subf %62, %61 : vector<16x1xf32>
    %64 = math.exp %63 : vector<16x1xf32>
    %cst_38 = arith.constant 1.000000e+00 : f32
    %65 = vector.broadcast %cst_38 : f32 to vector<16x1xf32>
    %66 = arith.addf %65, %64 : vector<16x1xf32>
    %67 = tpu.reciprocal %66 {approx = true} : vector<16x1xf32> -> vector<16x1xf32>
    %c0_39 = arith.constant 0 : index
    %c0_40 = arith.constant 0 : index
    %68 = vector.load %arg11[%c0_39, %c0_40] : memref<16x1xf32, #tpu.memory_space<vmem>>, vector<16x1xf32>
    tpu.vector_store %arg11[%c0_39, %c0_40], %67 {strides = array<i32>} : memref<16x1xf32, #tpu.memory_space<vmem>>, vector<16x1xf32>,
    return
  }
}

</mosaic_0001>

<bundles_post_ra>
// kernel: tpu_custom_call.1
= control target key start
LH: loop header
LB: loop body
LE: loop exit
PB: predicated region body
PF: predicated region fallthrough
CT: control target
= control target key end

     0   :  { %vm48_vm0 = vcmask 64512   ;;  %v951_v4 = vmov 0.0   ;;  %vm952_vm1 = vmmov 0   ;;  %v953_v6 = vmov 0   ;;  %s1114_s4 = inlined_call_operand.vmem [shape: f32[8,1], index: 4, kind: input, shape index: {}]   ;;  %s1115_s0 = inlined_call_operand.vmem [shape: f32[16,8], index: 0, kind: input, shape index: {}]   ;;  %s1116_s3 = inlined_call_operand.vmem [shape: f32[8,32], index: 3, kind: input, shape index: {}]   ;;  %s1117_s5 = inlined_call_operand.vmem [shape: f32[1,8], index: 5, kind: input, shape index: {}]   ;;  %s1118_s1 = inlined_call_operand.vmem [shape: f32[16,16], index: 1, kind: input, shape index: {}]   ;;  %s1119_s7 = inlined_call_operand.vmem [shape: f32[32,1], index: 7, kind: input, shape index: {}]   ;;  %s1120_s8 = inlined_call_operand.vmem [shape: f32[32,1], index: 8, kind: input, shape index: {}]   ;;  %s1121_s6 = inlined_call_operand.vmem [shape: f32[1,32], index: 6, kind: input, shape index: {}]   ;;  %s1122_s9 = inlined_call_operand.vmem [shape: f32[1,32], index: 9, kind: input, shape index: {}]   ;;  %s1123_s2 = inlined_call_operand.vmem [shape: f32[16,16], index: 2, kind: input, shape index: {}]   ;;  %s1124_s10 = inlined_call_operand.<no memory space> [shape: f32[1,1], index: 10, kind: input, shape index: {}]   ;;  %s1125_s11 = inlined_call_operand.vmem [shape: f32[16,1], index: 11, kind: output, shape index: {}]  }
   0x1   :  { %v43_v0 = vld [vmem:[%s1114_s4] sm:$0xff]  ;;  %v41_v2 = vld [vmem:[%s1115_s0 + $0x8] sm:$0xff]  ;;  %925 = vset.pattern.permute.xlu0 %v953_v6  ;;  %926 = vset.pattern.permute.xlu1 %v953_v6  ;;  %v288_v13 = vlaneseq  ;;  %vm302_vm3 = vcmask 130048   ;;  %v419_v41 = vld [vmem:[%s1119_s7 + $0x18] sm:$0xff]  ;;  %vm428_vm5 = vcmask 261120   ;;  %vm803_vm8 = vcmask 7168  }
   0x2   :  { %v40_v1 = vld [vmem:[%s1115_s0] sm:$0xff]  ;;  %867 = vmatprep.subr.mxu1 %v43_v0  ;;  %v46_v21 = vld [vmem:[%s1118_s1 + $0x8] sm:$0xff]  ;;  %v423_v42 = vld [vmem:[%s1120_s8 + $0x18] sm:$0xff] }
   0x3   :  { %869 = vmatprep.mubr.msk.f32.mxu1 %vm48_vm0, %v40_v1  ;;  %v42_v3 = vld [vmem:[%s1116_s3] sm:$0xff]  ;;  %868 = vmatpush3.msra.mxu1 %v43_v0  ;;  %v1040_v14 = vshrl.u32 %v288_v13, 7  ;;  %v418_v43 = vld [vmem:[%s1119_s7 + $0x10] sm:$0xff]  ;;  %v417_v45 = vld [vmem:[%s1119_s7 + $0x8] sm:$0xff] }
   0x4   :  { %862 = vmatprep.subr.mxu0 %v42_v3  ;;  %870 = vmatmul.mubr.msk.f32.vlgmr.msra.gmra.mxu1 %vm48_vm0, %v41_v2  ;;  %v44_v5 = vld [vmem:[%s1117_s5] sm:$0x1]  ;;  %v422_v44 = vld [vmem:[%s1120_s8 + $0x10] sm:$0xff]  ;;  %v421_v46 = vld [vmem:[%s1120_s8 + $0x8] sm:$0xff] }
   0x5   :  { %863 = vmatpush3.msra.mxu0 %v42_v3  ;;  %864 = vmatprep.mubr.msk.f32.mxu0 %vm48_vm0, %v40_v1  ;;  %v290_v15 = vsub.s32 0, %v1040_v14  ;;  %v45_v17 = vld [vmem:[%s1118_s1] sm:$0xff] }
   0x6   :  { %872 = vmatprep.subr.mxu0 %v951_v4  ;;  %865 = vmatmul.mubr.msk.f32.vlgmr.msra.gmra.mxu0 %vm48_vm0, %v41_v2  ;;  %v416_v47 = vld [vmem:[%s1119_s7] sm:$0xff] }
   0x7   :  { %873 = vmatpush3.xpose.msk.msra.mxu0 %vm48_vm0, %v41_v2  ;;  %876 = vmatprep.mubr.msk.f32.mxu0 %vm952_vm1, %v951_v4  ;;  %v420_v48 = vld [vmem:[%s1120_s8] sm:$0xff] }
   0x8   :  { %874 = vmatprep.subr.mxu0 %v951_v4  ;;  %v819_v53 = vld [vmem:[%s1121_s6] ss:$0 sm:$0xff] }
   0x9   :  { %v424_v62 = vld [vmem:[%s1122_s9] sm:$0x1] }
   0xa   :  { %v425_v6 = vld [vmem:[%s1123_s2] sm:$0xff] }
   0xb   :  { %875 = vmatpush3.xpose.msk.msra.mxu0 %vm48_vm0, %v40_v1 }
   0xc   :  { %897 = vmatprep.subr.mxu0 %v423_v42 }
   0xe   :  { %877 = vmatmul.mubr.msk.f32.vlgmr.msra.gmra.mxu0 %vm48_vm0, %v44_v5 }
   0xf   :  { %898 = vmatpush3.msra.mxu0 %v423_v42 }
  0x10   :  { %899 = vmatprep.subr.mxu0 %v422_v44 }
  0x11   :  { %900 = vmatpush3.msra.mxu0 %v422_v44 }
  0x12   :  { %901 = vmatprep.subr.mxu0 %v421_v46 }
  0x13   :  { %902 = vmatpush3.msra.mxu0 %v421_v46 }
  0x14   :  { %903 = vmatprep.subr.mxu0 %v420_v48 }
  0x15   :  { %904 = vmatpush3.msra.mxu0 %v420_v48 }
  0xc4   :  { %v871_v7 = vpop.f32.mrf.mxu1 }
  0xc6   :  { %v196_v8 = vpop.f32.mrf.mxu1  ;;  %v866_v9 = vpop.f32.mrf.mxu0 }
  0xc7   :  { %280 = vperm.xlu0 %925, %v196_v8   ;;  %879 = vmatprep.subr.mxu1 %v866_v9 }
  0xc8   :  { %v121_v10 = vpop.f32.mrf.mxu0  ;;  %880 = vmatpush3.msra.mxu1 %v866_v9 }
  0xc9   :  { %881 = vmatprep.subr.mxu1 %v121_v10 }
  0xca   :  { %882 = vmatpush3.msra.mxu1 %v121_v10  ;;  %v426_v10 = vld [vmem:[%s1123_s2 + $0x8] sm:$0xff] }
  0xcb   :  { %285 = vperm.xlu0 %925, %v871_v7   ;;  %886 = vmatprep.subr.mxu1 %v419_v41 }
  0xce   :  { %v274_v11 = vpop.f32.mrf.mxu0 }
  0xcf   :  { %v291_v16 = vrot.slane %v274_v11, %v290_v15 }
  0xd0   :  { %v878_v12 = vpop.f32.mrf.mxu0 }
 0x142   :  { %v281_v18 = vpop.permute.xlu0 %280 }
 0x143   :  { %v292_v19 = vadd.f32 %v291_v16, %v281_v18 }
 0x145   :  { %v294_v20 = vadd.f32 %v292_v19, %v45_v17 }
 0x146   :  { %v286_v22 = vpop.permute.xlu0 %285 }
 0x147   :  { %v293_v23 = vadd.f32 %v291_v16, %v286_v22  ;;  %vm296_vm2 = vcmp.lt.f32.partialorder %v294_v20, 0.0  ;;  %v298_v24 = vmul.f32 0.2, %v294_v20 }
 0x149   :  { %v295_v25 = vadd.f32 %v293_v23, %v46_v21  ;;  %v300_v26 = vsel %vm296_vm2, %v298_v24, %v294_v20 }
 0x14a   :  { %v303_v27 = vsel %vm302_vm3, %v300_v26, -inf }
 0x14b   :  { %304 = vmax.xlane.f32.xlu1 %v303_v27  ;;  %vm297_vm4 = vcmp.lt.f32.partialorder %v295_v25, 0.0  ;;  %v299_v28 = vmul.f32 0.2, %v295_v25 }
 0x14d   :  { %v301_v29 = vsel %vm297_vm4, %v299_v28, %v295_v25 }
 0x14e   :  { %v306_v30 = vsel %vm302_vm3, %v301_v29, -inf }
 0x14f   :  { %307 = vmax.xlane.f32.xlu1 %v306_v30  ;;  %v16_v30 = vstv %s1124_s10 }
 0x150   :  { %17 = vst [vmem:[#allocation2] sm:$0x1] %v16_v30 }
 0x1d4   :  { %v305_v31 = vpop.xlane.xlu1 %304 }
 0x1d5   :  { %v309_v32 = vsub.f32 %v300_v26, %v305_v31 }
 0x1d7   :  { %v311_v33 = vmul.f32 1.442695, %v309_v32 }
 0x1d8   :  { %v308_v34 = vpop.xlane.xlu1 %307 }
 0x1d9   :  { %927 = vpow2.f32 %v311_v33  ;;  %v310_v35 = vsub.f32 %v301_v29, %v308_v34  ;;  %v829_v34 = vld [vmem:[#allocation2] ss:$0 sm:$0xff] }
 0x1db   :  { %v313_v36 = vmul.f32 1.442695, %v310_v35 }
 0x1dd   :  { %929 = vpow2.f32 %v313_v36 }
 0x1e6   :  { %v928_v37 = vpop.eup %927 }
 0x1e7   :  { %883 = vmatprep.mubr.msk.f32.mxu1 %vm302_vm3, %v928_v37  ;;  %v315_v38 = vsel %vm302_vm3, %v928_v37, 0.0 }
 0x1e8   :  { %316 = vadd.xlane.f32.xlu0 %v315_v38 }
 0x1ea   :  { %v930_v39 = vpop.eup %929 }
 0x1eb   :  { %884 = vmatmul.mubr.msk.f32.vlgmr.msra.gmra.mxu1 %vm302_vm3, %v930_v39  ;;  %v318_v40 = vsel %vm302_vm3, %v930_v39, 0.0 }
 0x1ec   :  { %319 = vadd.xlane.f32.xlu1 %v318_v40  ;;  %887 = vmatpush3.msra.mxu1 %v419_v41 }
 0x1ed   :  { %888 = vmatprep.subr.mxu1 %v418_v43 }
 0x1ee   :  { %889 = vmatpush3.msra.mxu1 %v418_v43 }
 0x1ef   :  { %890 = vmatprep.subr.mxu1 %v417_v45 }
 0x1f0   :  { %891 = vmatpush3.msra.mxu1 %v417_v45 }
 0x1f1   :  { %892 = vmatprep.subr.mxu1 %v416_v47 }
 0x1f2   :  { %893 = vmatpush3.msra.mxu1 %v416_v47 }
 0x1f3   :  { %908 = vmatprep.subr.mxu1 %v951_v4 }
 0x271   :  { %v317_v50 = vpop.xlane.xlu0 %316 }
 0x275   :  { %v320_v49 = vpop.xlane.xlu1 %319 }
 0x276   :  { %931 = vrcp.f32 %v320_v49 }
 0x277   :  { %933 = vrcp.f32 %v317_v50 }
 0x283   :  { %v932_v51 = vpop.eup %931 }
 0x284   :  { %v934_v55 = vpop.eup %933 }
 0x2ab   :  { %v885_v52 = vpop.f32.mrf.mxu1 }
 0x2ac   :  { %v405_v54 = vmul.f32 %v932_v51, %v885_v52 }
 0x2ad   :  { %v393_v56 = vpop.f32.mrf.mxu1 }
 0x2ae   :  { %v404_v57 = vmul.f32 %v934_v55, %v393_v56  ;;  %v413_v58 = vadd.f32 %v819_v53, %v405_v54 }
 0x2b0   :  { %v412_v59 = vadd.f32 %v819_v53, %v404_v57  ;;  %v415_v61 = vmax.f32 %v413_v58, 0.0 }
 0x2b2   :  { %v414_v60 = vmax.f32 %v412_v59, 0.0 }
 0x2b4   :  { %894 = vmatprep.mubr.msk.f32.mxu1 %vm428_vm5, %v414_v60  ;;  %905 = vmatprep.mubr.msk.f32.mxu0 %vm428_vm5, %v414_v60 }
 0x2b5   :  { %895 = vmatmul.mubr.msk.f32.vlgmr.msra.gmra.mxu1 %vm428_vm5, %v415_v61  ;;  %906 = vmatmul.mubr.msk.f32.vlgmr.msra.gmra.mxu0 %vm428_vm5, %v415_v61 }
 0x2b6   :  { %909 = vmatpush3.xpose.msk.msra.mxu1 %vm428_vm5, %v415_v61  ;;  %912 = vmatprep.mubr.msk.f32.mxu1 %vm952_vm1, %v951_v4 }
 0x2b7   :  { %910 = vmatprep.subr.mxu1 %v951_v4 }
 0x2ba   :  { %911 = vmatpush3.xpose.msk.msra.mxu1 %vm428_vm5, %v414_v60 }
 0x2bd   :  { %913 = vmatmul.mubr.msk.f32.vlgmr.msra.gmra.mxu1 %vm428_vm5, %v424_v62 }
 0x375   :  { %v896_v63 = vpop.f32.mrf.mxu1  ;;  %v907_v0 = vpop.f32.mrf.mxu0 }
 0x376   :  { %915 = vmatprep.subr.mxu0 %v896_v63 }
 0x377   :  { %v501_v1 = vpop.f32.mrf.mxu1  ;;  %v576_v2 = vpop.f32.mrf.mxu0  ;;  %916 = vmatpush3.msra.mxu0 %v896_v63 }
 0x378   :  { %917 = vmatprep.subr.mxu0 %v501_v1  ;;  %660 = vperm.xlu1 %926, %v576_v2  }
 0x379   :  { %918 = vmatpush3.msra.mxu0 %v501_v1 }
 0x37c   :  { %665 = vperm.xlu1 %926, %v907_v0  }
 0x37d   :  { %v654_v3 = vpop.f32.mrf.mxu1 }
 0x37e   :  { %v671_v4 = vrot.slane %v654_v3, %v290_v15 }
 0x37f   :  { %v914_v5 = vpop.f32.mrf.mxu1 }
 0x3f3   :  { %v661_v7 = vpop.permute.xlu1 %660 }
 0x3f4   :  { %v672_v8 = vadd.f32 %v671_v4, %v661_v7 }
 0x3f6   :  { %v674_v9 = vadd.f32 %v672_v8, %v425_v6 }
 0x3f7   :  { %v666_v11 = vpop.permute.xlu1 %665 }
 0x3f8   :  { %v673_v12 = vadd.f32 %v671_v4, %v666_v11  ;;  %vm676_vm6 = vcmp.lt.f32.partialorder %v674_v9, 0.0  ;;  %v678_v13 = vmul.f32 0.2, %v674_v9 }
 0x3fa   :  { %v675_v16 = vadd.f32 %v673_v12, %v426_v10  ;;  %v680_v17 = vsel %vm676_vm6, %v678_v13, %v674_v9 }
 0x3fb   :  { %v682_v14 = vsel %vm302_vm3, %v680_v17, -inf }
 0x3fc   :  { %683 = vmax.xlane.f32.xlu1 %v682_v14  ;;  %vm677_vm7 = vcmp.lt.f32.partialorder %v675_v16, 0.0  ;;  %v679_v15 = vmul.f32 0.2, %v675_v16 }
 0x3fe   :  { %v681_v18 = vsel %vm677_vm7, %v679_v15, %v675_v16 }
 0x3ff   :  { %v685_v19 = vsel %vm302_vm3, %v681_v18, -inf }
 0x400   :  { %686 = vmax.xlane.f32.xlu0 %v685_v19 }
 0x485   :  { %v684_v20 = vpop.xlane.xlu1 %683 }
 0x486   :  { %v688_v21 = vsub.f32 %v680_v17, %v684_v20 }
 0x488   :  { %v690_v22 = vmul.f32 1.442695, %v688_v21 }
 0x489   :  { %v687_v23 = vpop.xlane.xlu0 %686 }
 0x48a   :  { %935 = vpow2.f32 %v690_v22  ;;  %v689_v24 = vsub.f32 %v681_v18, %v687_v23 }
 0x48c   :  { %v692_v25 = vmul.f32 1.442695, %v689_v24 }
 0x48e   :  { %937 = vpow2.f32 %v692_v25 }
 0x497   :  { %v936_v26 = vpop.eup %935 }
 0x498   :  { %919 = vmatprep.mubr.msk.f32.mxu0 %vm302_vm3, %v936_v26  ;;  %v694_v27 = vsel %vm302_vm3, %v936_v26, 0.0 }
 0x499   :  { %695 = vadd.xlane.f32.xlu0 %v694_v27 }
 0x49b   :  { %v938_v28 = vpop.eup %937 }
 0x49c   :  { %920 = vmatmul.mubr.msk.f32.vlgmr.msra.gmra.mxu0 %vm302_vm3, %v938_v28  ;;  %v697_v29 = vsel %vm302_vm3, %v938_v28, 0.0 }
 0x49d   :  { %698 = vadd.xlane.f32.xlu0 %v697_v29 }
 0x522   :  { %v696_v31 = vpop.xlane.xlu0 %695 }
 0x526   :  { %v699_v32 = vpop.xlane.xlu0 %698 }
 0x527   :  { %939 = vrcp.f32 %v699_v32 }
 0x528   :  { %941 = vrcp.f32 %v696_v31 }
 0x534   :  { %v940_v33 = vpop.eup %939 }
 0x535   :  { %v942_v37 = vpop.eup %941 }
 0x55c   :  { %v921_v35 = vpop.f32.mrf.mxu0 }
 0x55d   :  { %v784_v36 = vmul.f32 %v940_v33, %v921_v35 }
 0x55e   :  { %v772_v38 = vpop.f32.mrf.mxu0 }
 0x55f   :  { %v792_v39 = vadd.f32 %v829_v34, %v784_v36  ;;  %v783_v40 = vmul.f32 %v942_v37, %v772_v38 }
 0x561   :  { %v794_v41 = vsub.f32 0.0, %v792_v39  ;;  %v791_v42 = vadd.f32 %v829_v34, %v783_v40 }
 0x563   :  { %v797_v43 = vmul.f32 1.442695, %v794_v41  ;;  %v793_v44 = vsub.f32 0.0, %v791_v42 }
 0x565   :  { %943 = vpow2.f32 %v797_v43  ;;  %v795_v45 = vmul.f32 1.442695, %v793_v44 }
 0x567   :  { %945 = vpow2.f32 %v795_v45 }
 0x572   :  { %v944_v46 = vpop.eup %943 }
 0x573   :  { %v800_v47 = vadd.f32 1.0, %v944_v46 }
 0x574   :  { %v946_v48 = vpop.eup %945 }
 0x575   :  { %947 = vrcp.f32 %v800_v47  ;;  %v799_v49 = vadd.f32 1.0, %v946_v48 }
 0x577   :  { %949 = vrcp.f32 %v799_v49 }
 0x582   :  { %v948_v50 = vpop.eup %947 }
 0x583   :  { %805 = vst.msk [vmem:[%s1125_s11 + $0x8] sm:$0xff] %vm803_vm8, %v948_v50 }
 0x584   :  { %v950_v51 = vpop.eup %949 }
 0x585   :  { %804 = vst.msk [vmem:[%s1125_s11] sm:$0xff] %vm803_vm8, %v950_v51 }

</bundles_post_ra>
